<compile_context>
chip_gen: v6e
topology: v6e:2x2x1
jax: 0.10.0
libtpu: 0.0.40
codegen_flags: <defaults>
</compile_context>

<pallas_src>
import jax
import jax.numpy as jnp
from jax import lax
from jax.experimental import pallas as pl
from jax.experimental.pallas import tpu as pltpu

PACK = 128 // 8              # 16 logical rows packed per 128-lane vector row
DEFAULT_TILE_ROWS = 8192     # target packed rows per grid step (= 131072 batch rows)
VMEM_LIMIT_BYTES = 48 * 1024 * 1024   # < physical VMEM on v5e/v6e (128 MiB) and v7x (64 MiB/TC)


def _ceil_div(a, b):
    return -(-a // b)


def _round_up(a, b):
    return _ceil_div(a, b) * b


def _sigmoid(x):
    # exp() rides the EUP slot; the divide stays on the VPU, which has slack
    # in this HBM-bound kernel.
    return 1.0 / (1.0 + jnp.exp(-x))


def _silu(x):
    return x * _sigmoid(x)


def classifier3_kernel(x_ref, w1_ref, b1_ref, w2_ref, b2_ref, w3_ref, b3_ref,
                       o_ref):
    # x_ref: (T, 128) bf16, lane-dense; each row packs 16 batch rows x 8 feats.
    x = x_ref[...]

    # hidden1 + SiLU : (T,128)bf16 @ (128,192)bf16 -> f32 accumulate
    h1 = jnp.dot(x, w1_ref[...], preferred_element_type=jnp.float32,
                 precision=lax.Precision.DEFAULT)
    h1 = _silu(h1 + b1_ref[...]).astype(jnp.bfloat16)

    # hidden2 + SiLU : (T,192)bf16 @ (192,128)bf16 -> f32 accumulate
    h2 = jnp.dot(h1, w2_ref[...], preferred_element_type=jnp.float32,
                 precision=lax.Precision.DEFAULT)
    h2 = _silu(h2 + b2_ref[...]).astype(jnp.bfloat16)

    # output + Sigmoid : (T,128)bf16 @ (128,16)bf16 -> f32 -> bf16 store
    h3 = jnp.dot(h2, w3_ref[...], preferred_element_type=jnp.float32,
                 precision=lax.Precision.DEFAULT)
    o_ref[...] = _sigmoid(h3 + b3_ref[...]).astype(o_ref.dtype)


def _block_diag(w):
    """kron(I_PACK, w): apply the same tiny Linear to all 16 packed rows."""
    return jnp.kron(jnp.eye(PACK, dtype=w.dtype), w)


def pack_params(params):
    """One-off packing of the tiny weights into lane-dense block-diag form.

    Weights are cast to bf16 (they feed the MXU); biases stay f32 (added to
    the f32 accumulator, negligible traffic).  Hoisted out of the per-call
    path so repeated forward calls pay nothing for it.
    """
    return {
        "w1": _block_diag(params["w1"]).astype(jnp.bfloat16),          # (128, 192)
        "b1": jnp.tile(params["b1"], (1, PACK)).astype(jnp.float32),   # (1, 192)
        "w2": _block_diag(params["w2"]).astype(jnp.bfloat16),          # (192, 128)
        "b2": jnp.tile(params["b2"], (1, PACK)).astype(jnp.float32),   # (1, 128)
        "w3": _block_diag(params["w3"]).astype(jnp.bfloat16),          # (128, 16)
        "b3": jnp.tile(params["b3"], (1, PACK)).astype(jnp.float32),   # (1, 16)
    }


def _choose_tiling(rows, target_rows, min_steps=2):
    """Balanced tile size over packed rows.

    - every tile is a multiple of 8 sublanes,
    - only the last tile is partial (negligible padding at any B),
    - >= min_steps grid steps whenever rows allow it, so v7x's two
      TensorCores both get work under dimension_semantics=("parallel",).
    """
    max_steps = max(1, rows // 8)                      # keep every tile >= 8 rows
    steps = min(max(_ceil_div(rows, target_rows), min_steps), max_steps)
    tile = _round_up(_ceil_div(rows, steps), 8)
    steps = _ceil_div(rows, tile)
    return tile, steps, steps * tile


def classifier3_forward(x, packed, *, target_tile_rows=DEFAULT_TILE_ROWS):
    """x: (B, 8) float32.  packed: output of pack_params()."""
    B, F = x.shape
    assert F == 8

    rows = _ceil_div(B, PACK)                          # packed 128-lane rows
    tile_rows, n_steps, rows_padded = _choose_tiling(rows, target_tile_rows)
    b_padded = rows_padded * PACK
    if b_padded != B:                                  # static-shape Python branch
        x = jnp.pad(x, ((0, b_padded - B), (0, 0)))    # padded rows sliced off below
    # Free contiguous reshape + bf16 cast (halves HBM read traffic).
    x_packed = x.reshape(rows_padded, PACK * 8).astype(jnp.bfloat16)

    def resident(shape):                               # weights stay in VMEM
        return pl.BlockSpec(shape, lambda i: (0, 0))

    # Advisory cost hint for XLA scheduling around the (mem-bound) custom call.
    flops = 2 * rows_padded * (128 * 12 * PACK + 12 * PACK * 128 + 128 * PACK)
    transcendentals = rows_padded * (12 * PACK + 128 + PACK)      # one exp each
    bytes_accessed = (x_packed.size * 2 + rows_padded * PACK * 2
                      + sum(int(v.size) * v.dtype.itemsize for v in packed.values()))

    out_packed = pl.pallas_call(
        classifier3_kernel,
        out_shape=jax.ShapeDtypeStruct((rows_padded, PACK), jnp.bfloat16),
        grid=(n_steps,),
        in_specs=[
            pl.BlockSpec((tile_rows, 128), lambda i: (i, 0)),     # x tile
            resident((128, 12 * PACK)), resident((1, 12 * PACK)),
            resident((12 * PACK, 128)), resident((1, 128)),
            resident((128, PACK)), resident((1, PACK)),
        ],
        out_specs=pl.BlockSpec((tile_rows, PACK), lambda i: (i, 0)),
        compiler_params=pltpu.CompilerParams(
            dimension_semantics=("parallel",),         # both TCs on v7x
            vmem_limit_bytes=VMEM_LIMIT_BYTES),
        cost_estimate=pl.CostEstimate(flops=flops,
                                      transcendentals=transcendentals,
                                      bytes_accessed=bytes_accessed),
    )(x_packed, packed["w1"], packed["b1"], packed["w2"], packed["b2"],
      packed["w3"], packed["b3"])

    # (rows_padded, 16) -> (b_padded, 1) is a free contiguous reshape; return
    # f32 to match the PyTorch module's output dtype.
    return out_packed.reshape(b_padded, 1)[:B].astype(jnp.float32)


def init_params(key):
    """Deterministic init matching PyTorch Linear shapes.

    PyTorch stores Linear weights as (out, in); build them that way and
    transpose to (in, out) for the kernel's x @ W convention.
    """
    ks = jax.random.split(key, 6)

    def linear(kw, kb, fan_in, fan_out):
        bound = 1.0 / jnp.sqrt(fan_in)
        w_pt = jax.random.uniform(kw, (fan_out, fan_in), jnp.float32,
                                  -bound, bound)       # PyTorch layout (out, in)
        b_pt = jax.random.uniform(kb, (fan_out,), jnp.float32, -bound, bound)
        return w_pt.T, b_pt.reshape(1, fan_out)        # kernel layout

    w1, b1 = linear(ks[0], ks[1], 8, 12)
    w2, b2 = linear(ks[2], ks[3], 12, 8)
    w3, b3 = linear(ks[4], ks[5], 8, 1)
    return {"w1": w1, "b1": b1, "w2": w2, "b2": b2, "w3": w3, "b3": b3}


def reference_forward(x, p):
    h1 = jax.nn.silu(x @ p["w1"] + p["b1"])
    h2 = jax.nn.silu(h1 @ p["w2"] + p["b2"])
    return jax.nn.sigmoid(h2 @ p["w3"] + p["b3"])


if __name__ == "__main__":
    key = jax.random.PRNGKey(0)
    k_x, k_p = jax.random.split(key)

    B = 1000                       # small; deliberately not a multiple of 16
    x = jax.random.normal(k_x, (B, 8), jnp.float32)
    params = init_params(k_p)
    packed = pack_params(params)   # one-off weight packing, hoisted out of the call

    fwd = jax.jit(classifier3_forward)
    out = jax.block_until_ready(fwd(x, packed))

    ref = reference_forward(x, params)
    assert out.shape == (B, 1), out.shape
    max_err = float(jnp.max(jnp.abs(out - ref)))
    # bf16 inputs/weights/activations vs. an f32 reference -> loose tolerance.
    assert max_err < 2e-2, max_err
    print("KERNEL_OK")
</pallas_src>

<mosaic_0001>
module attributes {stable_mosaic.version = 11 : i64} {
  func.func @classifier3_kernel(%arg0: i32, %arg1: memref<32x128xbf16, #tpu.memory_space<vmem>>, %arg2: memref<128x192xbf16, #tpu.memory_space<vmem>>, %arg3: memref<1x192xf32, #tpu.memory_space<vmem>>, %arg4: memref<192x128xbf16, #tpu.memory_space<vmem>>, %arg5: memref<1x128xf32, #tpu.memory_space<vmem>>, %arg6: memref<128x16xbf16, #tpu.memory_space<vmem>>, %arg7: memref<1x16xf32, #tpu.memory_space<vmem>>, %arg8: memref<32x16xbf16, #tpu.memory_space<vmem>>) attributes {dimension_semantics = [#tpu.dimension_semantics<parallel>], iteration_bounds = array<i64: 2>, scalar_prefetch = 0 : i64, scratch_operands = 0 : i64, tpu.core_type = #tpu.core_type<tc>, window_params = [{transform_indices = @transform_0, window_bounds = array<i64: 32, 128>}, {pipeline_mode = #tpu.pipeline_mode<synchronous>, transform_indices = @transform_1, window_bounds = array<i64: 128, 192>}, {pipeline_mode = #tpu.pipeline_mode<synchronous>, transform_indices = @transform_2, window_bounds = array<i64: 1, 192>}, {pipeline_mode = #tpu.pipeline_mode<synchronous>, transform_indices = @transform_3, window_bounds = array<i64: 192, 128>}, {pipeline_mode = #tpu.pipeline_mode<synchronous>, transform_indices = @transform_4, window_bounds = array<i64: 1, 128>}, {pipeline_mode = #tpu.pipeline_mode<synchronous>, transform_indices = @transform_5, window_bounds = array<i64: 128, 16>}, {pipeline_mode = #tpu.pipeline_mode<synchronous>, transform_indices = @transform_6, window_bounds = array<i64: 1, 16>}, {transform_indices = @transform_7, window_bounds = array<i64: 32, 16>}]} {
    %c0 = arith.constant 0 : index
    %c0_0 = arith.constant 0 : index
    %0 = vector.load %arg1[%c0, %c0_0] : memref<32x128xbf16, #tpu.memory_space<vmem>>, vector<32x128xbf16>
    %c0_1 = arith.constant 0 : index
    %c0_2 = arith.constant 0 : index
    %1 = vector.load %arg2[%c0_1, %c0_2] : memref<128x192xbf16, #tpu.memory_space<vmem>>, vector<128x192xbf16>
    %cst = arith.constant dense<0.000000e+00> : vector<32x192xf32>
    %2 = tpu.matmul %0, %1, %cst {dimension_numbers = #tpu.dot_dimension_numbers<[1], [0], [0], [1], [0, 0, 1, 1], [], []>} : vector<32x128xbf16>, vector<128x192xbf16>, vector<32x192xf32> -> vector<32x192xf32>
    %c0_3 = arith.constant 0 : index
    %c0_4 = arith.constant 0 : index
    %3 = vector.load %arg3[%c0_3, %c0_4] : memref<1x192xf32, #tpu.memory_space<vmem>>, vector<1x192xf32>
    %4 = vector.broadcast %3 : vector<1x192xf32> to vector<32x192xf32>
    %5 = arith.addf %2, %4 : vector<32x192xf32>
    %cst_5 = arith.constant 0.000000e+00 : f32
    %6 = vector.broadcast %cst_5 : f32 to vector<32x192xf32>
    %7 = arith.subf %6, %5 : vector<32x192xf32>
    %8 = math.exp %7 : vector<32x192xf32>
    %cst_6 = arith.constant 1.000000e+00 : f32
    %9 = vector.broadcast %cst_6 : f32 to vector<32x192xf32>
    %10 = arith.addf %9, %8 : vector<32x192xf32>
    %cst_7 = arith.constant 1.000000e+00 : f32
    %11 = vector.broadcast %cst_7 : f32 to vector<32x192xf32>
    %12 = arith.divf %11, %10 : vector<32x192xf32>
    %13 = arith.mulf %5, %12 : vector<32x192xf32>
    %14 = arith.truncf %13 : vector<32x192xf32> to vector<32x192xbf16>
    %c0_8 = arith.constant 0 : index
    %c0_9 = arith.constant 0 : index
    %15 = vector.load %arg4[%c0_8, %c0_9] : memref<192x128xbf16, #tpu.memory_space<vmem>>, vector<192x128xbf16>
    %cst_10 = arith.constant dense<0.000000e+00> : vector<32x128xf32>
    %16 = tpu.matmul %14, %15, %cst_10 {dimension_numbers = #tpu.dot_dimension_numbers<[1], [0], [0], [1], [0, 0, 1, 1], [], []>} : vector<32x192xbf16>, vector<192x128xbf16>, vector<32x128xf32> -> vector<32x128xf32>
    %c0_11 = arith.constant 0 : index
    %c0_12 = arith.constant 0 : index
    %17 = vector.load %arg5[%c0_11, %c0_12] : memref<1x128xf32, #tpu.memory_space<vmem>>, vector<1x128xf32>
    %18 = vector.broadcast %17 : vector<1x128xf32> to vector<32x128xf32>
    %19 = arith.addf %16, %18 : vector<32x128xf32>
    %cst_13 = arith.constant 0.000000e+00 : f32
    %20 = vector.broadcast %cst_13 : f32 to vector<32x128xf32>
    %21 = arith.subf %20, %19 : vector<32x128xf32>
    %22 = math.exp %21 : vector<32x128xf32>
    %cst_14 = arith.constant 1.000000e+00 : f32
    %23 = vector.broadcast %cst_14 : f32 to vector<32x128xf32>
    %24 = arith.addf %23, %22 : vector<32x128xf32>
    %cst_15 = arith.constant 1.000000e+00 : f32
    %25 = vector.broadcast %cst_15 : f32 to vector<32x128xf32>
    %26 = arith.divf %25, %24 : vector<32x128xf32>
    %27 = arith.mulf %19, %26 : vector<32x128xf32>
    %28 = arith.truncf %27 : vector<32x128xf32> to vector<32x128xbf16>
    %c0_16 = arith.constant 0 : index
    %c0_17 = arith.constant 0 : index
    %29 = vector.load %arg6[%c0_16, %c0_17] : memref<128x16xbf16, #tpu.memory_space<vmem>>, vector<128x16xbf16>
    %cst_18 = arith.constant dense<0.000000e+00> : vector<32x16xf32>
    %30 = tpu.matmul %28, %29, %cst_18 {dimension_numbers = #tpu.dot_dimension_numbers<[1], [0], [0], [1], [0, 0, 1, 1], [], []>} : vector<32x128xbf16>, vector<128x16xbf16>, vector<32x16xf32> -> vector<32x16xf32>
    %c0_19 = arith.constant 0 : index
    %c0_20 = arith.constant 0 : index
    %31 = vector.load %arg7[%c0_19, %c0_20] : memref<1x16xf32, #tpu.memory_space<vmem>>, vector<1x16xf32>
    %32 = vector.broadcast %31 : vector<1x16xf32> to vector<32x16xf32>
    %33 = arith.addf %30, %32 : vector<32x16xf32>
    %cst_21 = arith.constant 0.000000e+00 : f32
    %34 = vector.broadcast %cst_21 : f32 to vector<32x16xf32>
    %35 = arith.subf %34, %33 : vector<32x16xf32>
    %36 = math.exp %35 : vector<32x16xf32>
    %cst_22 = arith.constant 1.000000e+00 : f32
    %37 = vector.broadcast %cst_22 : f32 to vector<32x16xf32>
    %38 = arith.addf %37, %36 : vector<32x16xf32>
    %cst_23 = arith.constant 1.000000e+00 : f32
    %39 = vector.broadcast %cst_23 : f32 to vector<32x16xf32>
    %40 = arith.divf %39, %38 : vector<32x16xf32>
    %41 = arith.truncf %40 : vector<32x16xf32> to vector<32x16xbf16>
    %c0_24 = arith.constant 0 : index
    %c0_25 = arith.constant 0 : index
    %42 = vector.load %arg8[%c0_24, %c0_25] : memref<32x16xbf16, #tpu.memory_space<vmem>>, vector<32x16xbf16>
    tpu.vector_store %arg8[%c0_24, %c0_25], %41 {strides = array<i32>} : memref<32x16xbf16, #tpu.memory_space<vmem>>, vector<32x16xbf16>,
    return
  }
  func.func @transform_0(%arg0: i32) -> (i32, i32) {
    %c0_i32 = arith.constant 0 : i32
    %c0_i32_0 = arith.constant 0 : i32
    return %arg0, %c0_i32 : i32, i32
  }
  func.func @transform_1(%arg0: i32) -> (i32, i32) {
    %c0_i32 = arith.constant 0 : i32
    %c0_i32_0 = arith.constant 0 : i32
    %c0_i32_1 = arith.constant 0 : i32
    return %c0_i32, %c0_i32_0 : i32, i32
  }
  func.func @transform_2(%arg0: i32) -> (i32, i32) {
    %c0_i32 = arith.constant 0 : i32
    %c0_i32_0 = arith.constant 0 : i32
    %c0_i32_1 = arith.constant 0 : i32
    return %c0_i32, %c0_i32_0 : i32, i32
  }
  func.func @transform_3(%arg0: i32) -> (i32, i32) {
    %c0_i32 = arith.constant 0 : i32
    %c0_i32_0 = arith.constant 0 : i32
    %c0_i32_1 = arith.constant 0 : i32
    return %c0_i32, %c0_i32_0 : i32, i32
  }
  func.func @transform_4(%arg0: i32) -> (i32, i32) {
    %c0_i32 = arith.constant 0 : i32
    %c0_i32_0 = arith.constant 0 : i32
    %c0_i32_1 = arith.constant 0 : i32
    return %c0_i32, %c0_i32_0 : i32, i32
  }
  func.func @transform_5(%arg0: i32) -> (i32, i32) {
    %c0_i32 = arith.constant 0 : i32
    %c0_i32_0 = arith.constant 0 : i32
    %c0_i32_1 = arith.constant 0 : i32
    return %c0_i32, %c0_i32_0 : i32, i32
  }
  func.func @transform_6(%arg0: i32) -> (i32, i32) {
    %c0_i32 = arith.constant 0 : i32
    %c0_i32_0 = arith.constant 0 : i32
    %c0_i32_1 = arith.constant 0 : i32
    return %c0_i32, %c0_i32_0 : i32, i32
  }
  func.func @transform_7(%arg0: i32) -> (i32, i32) {
    %c0_i32 = arith.constant 0 : i32
    %c0_i32_0 = arith.constant 0 : i32
    return %arg0, %c0_i32 : i32, i32
  }
}

</mosaic_0001>

<bundles_post_ra>
// kernel: classifier3_forward.1
= control target key start
LH: loop header
LB: loop body
LE: loop exit
PB: predicated region body
PF: predicated region fallthrough
CT: control target
= control target key end

     0   :  { %s1189_s24 = smov 0   ;;  %s1356_s0 = inlined_call_operand.vmem [shape: bf16[64,128], index: 0, kind: input, shape index: {}]   ;;  %s1357_s1 = inlined_call_operand.vmem [shape: bf16[128,192], index: 1, kind: input, shape index: {}]   ;;  %s1358_s2 = inlined_call_operand.vmem [shape: f32[1,192], index: 2, kind: input, shape index: {}]   ;;  %s1359_s3 = inlined_call_operand.vmem [shape: bf16[192,128], index: 3, kind: input, shape index: {}]   ;;  %s1360_s4 = inlined_call_operand.vmem [shape: f32[1,128], index: 4, kind: input, shape index: {}]   ;;  %s1361_s5 = inlined_call_operand.vmem [shape: bf16[128,16], index: 5, kind: input, shape index: {}]   ;;  %s1362_s6 = inlined_call_operand.vmem [shape: f32[1,16], index: 6, kind: input, shape index: {}]   ;;  %s1363_s7 = inlined_call_operand.vmem [shape: bf16[64,16], index: 7, kind: output, shape index: {}]  }
   0x1 LB: > { %s930_s25 = sadd.s32 4294967295, %s1146_s24   ;;  %p934_p0 = scmp.ge.s32.totalorder %s1146_s24, 1  ;;  %s1146_s24 = sphi %s1189_s24, %s17_s24  }
   0x2   : > { %p238_p1 = scmp.lt.s32.totalorder %s1146_s24, 3 }
   0x4   : > { %p239_p2 = pnand %p934_p0, %p238_p1 }
   0x5   : > { %s935_s28 = sshll.u32 (!%p239_p2), %s930_s25, 2 }
   0x6   : > { %242 = sbr.rel (%p239_p2) target bundleno = 768 (0x300), region = 48  ;;  %p271_p3 = scmp.lt.s32.totalorder (!%p239_p2), %s935_s28, 7 }
   0xb   : > { %v1030_v0 = vld [vmem:[%s1357_s1 + $0x74] ss:$8 sps:$4 sm:$0xff]   ;;  %v1032_v1 = vld [vmem:[%s1357_s1 + $0x70] ss:$8 sps:$4 sm:$0xff]   ;;  %v1148_v2 = vmov 0   ;;  %s1365_s28 = smov (!%p271_p3, %s935_s28), 7  ;;  %v305_v31 = vlaneseq }
   0xc   : > { %439 = vmatprep.mubr.bf16.mxu0 %v1148_v2  ;;  %630 = vmatprep.subr.bf16.mxu1 %v1148_v2  ;;  %v1033_v3 = vld [vmem:[%s1357_s1 + $0x64] ss:$8 sps:$4 sm:$0xff]   ;;  %v1035_v4 = vld [vmem:[%s1357_s1 + $0x60] ss:$8 sps:$4 sm:$0xff]   ;;  %v1036_v5 = vld [vmem:[%s1357_s1 + $0x54] ss:$8 sps:$4 sm:$0xff]  }
   0xd   : > { %407 = vmatprep.subr.bf16.mxu0 %v1030_v0  ;;  %s936_s14 = sshll.u32 %s1365_s28, 2  ;;  %v1038_v6 = vld [vmem:[%s1357_s1 + $0x50] ss:$8 sps:$4 sm:$0xff]   ;;  %v1039_v7 = vld [vmem:[%s1357_s1 + $0x44] ss:$8 sps:$4 sm:$0xff]   ;;  %v306_v32 = vshrl.u32 %v305_v31, 7 }
   0xe   : > { %408 = vmatpush1.bf16.msra.mxu0 %v1032_v1  ;;  %s274_s21 = scalar_lea.vmem %s1356_s0, %s936_s14  ;;  %v1041_v8 = vld [vmem:[%s1357_s1 + $0x40] ss:$8 sps:$4 sm:$0xff]   ;;  %v1042_v9 = vld [vmem:[%s1357_s1 + $0x34] ss:$8 sps:$4 sm:$0xff]   ;;  %v1044_v10 = vld [vmem:[%s1357_s1 + $0x30] ss:$8 sps:$4 sm:$0xff]   ;;  %s280_s30 = scalar_lea.vmem %s1363_s7, %s936_s14 }
   0xf   : > { %409 = vmatprep.subr.bf16.mxu0 %v1033_v3  ;;  %v1045_v11 = vld [vmem:[%s1357_s1 + $0x24] ss:$8 sps:$4 sm:$0xff]   ;;  %v1047_v12 = vld [vmem:[%s1357_s1 + $0x20] ss:$8 sps:$4 sm:$0xff]   ;;  %v1048_v13 = vld [vmem:[%s1357_s1 + $0x14] ss:$8 sps:$4 sm:$0xff]  }
  0x10   : > { %v1050_v14 = vld [vmem:[%s1357_s1 + $0x10] ss:$8 sps:$4 sm:$0xff]   ;;  %v1051_v15 = vld [vmem:[%s1357_s1 + $0x4] ss:$8 sps:$4 sm:$0xff]   ;;  %v1053_v16 = vld [vmem:[%s1357_s1] ss:$8 sps:$4 sm:$0xff]  }
  0x11   : > { %v1054_v17 = vld [vmem:[%s274_s21] sm:$0xff]   ;;  %v1055_v18 = vld [vmem:[%s274_s21 + $0x8] sm:$0xff]   ;;  %v1056_v19 = vld [vmem:[%s1359_s3 + $0x38] sm:$0xff]   ;;  %v307_v33 = vsub.s32 0, %v306_v32  ;;  %v311_v35 = vsub.s32 1, %v306_v32  ;;  %vm623_vm0 = vcmask 523264  }
  0x12   : > { %410 = vmatpush1.bf16.msra.mxu0 %v1035_v4  ;;  %631 = vmatpush1.bf16.msra.mxu1 %v1056_v19  ;;  %v1057_v20 = vld [vmem:[%s1359_s3 + $0x30] sm:$0xff]   ;;  %v1058_v21 = vld [vmem:[%s1359_s3 + $0x28] sm:$0xff]   ;;  %v1059_v22 = vld [vmem:[%s1359_s3 + $0x20] sm:$0xff]   ;;  %vm869_vm1 = vcmask 125952  }
  0x13   : > { %411 = vmatprep.subr.bf16.mxu0 %v1036_v5  ;;  %632 = vmatprep.subr.bf16.mxu1 %v1148_v2  ;;  %v1060_v23 = vld [vmem:[%s1359_s3 + $0x18] sm:$0xff]   ;;  %v1061_v24 = vld [vmem:[%s1359_s3 + $0x10] sm:$0xff]   ;;  %v1062_v25 = vld [vmem:[%s1359_s3 + $0x8] sm:$0xff]  }
  0x14   : > { %v1063_v26 = vld [vmem:[%s1359_s3] sm:$0xff]   ;;  %v1064_v27 = vld [vmem:[%s1359_s3 + $0x58] sm:$0xff]   ;;  %v1065_v28 = vld [vmem:[%s1359_s3 + $0x50] sm:$0xff]  }
  0x15   : > { %v1066_v29 = vld [vmem:[%s1359_s3 + $0x48] sm:$0xff]   ;;  %v1067_v30 = vld [vmem:[%s1359_s3 + $0x40] sm:$0xff]  }
  0x16   : > { %412 = vmatpush1.bf16.msra.mxu0 %v1038_v6  ;;  %633 = vmatpush1.bf16.msra.mxu1 %v1057_v20  ;;  %v303_v34 = vld [vmem:[%s1358_s2] sm:$0x3] }
  0x17   : > { %413 = vmatprep.subr.bf16.mxu0 %v1039_v7  ;;  %634 = vmatprep.subr.bf16.mxu1 %v1148_v2  ;;  %v308_v36 = vrot.slane %v303_v34, %v307_v33  ;;  %v312_v37 = vrot.slane %v303_v34, %v311_v35 }
  0x1a   : > { %414 = vmatpush1.bf16.msra.mxu0 %v1041_v8  ;;  %635 = vmatpush1.bf16.msra.mxu1 %v1058_v21 }
  0x1b   : > { %415 = vmatprep.subr.bf16.mxu0 %v1042_v9  ;;  %636 = vmatprep.subr.bf16.mxu1 %v1148_v2 }
  0x1e   : > { %416 = vmatpush1.bf16.msra.mxu0 %v1044_v10  ;;  %637 = vmatpush1.bf16.msra.mxu1 %v1059_v22 }
  0x1f   : > { %417 = vmatprep.subr.bf16.mxu0 %v1045_v11  ;;  %638 = vmatprep.subr.bf16.mxu1 %v1148_v2 }
  0x22   : > { %418 = vmatpush1.bf16.msra.mxu0 %v1047_v12  ;;  %639 = vmatpush1.bf16.msra.mxu1 %v1060_v23 }
  0x23   : > { %419 = vmatprep.subr.bf16.mxu0 %v1048_v13  ;;  %640 = vmatprep.subr.bf16.mxu1 %v1148_v2 }
  0x26   : > { %420 = vmatpush1.bf16.msra.mxu0 %v1050_v14  ;;  %641 = vmatpush1.bf16.msra.mxu1 %v1061_v24 }
  0x27   : > { %421 = vmatprep.subr.bf16.mxu0 %v1051_v15  ;;  %642 = vmatprep.subr.bf16.mxu1 %v1148_v2 }
  0x2a   : > { %422 = vmatpush1.bf16.msra.mxu0 %v1053_v16  ;;  %643 = vmatpush1.bf16.msra.mxu1 %v1062_v25 }
  0x2b   : > { %644 = vmatprep.subr.bf16.mxu1 %v1148_v2 }
  0x2d   : > { %440 = vmatmul.mubr.bf16.vlgmr.msra.gmra.mxu0 %v1054_v17 }
  0x2e   : > { %449 = vmatprep.mubr.bf16.mxu0 %v1148_v2  ;;  %645 = vmatpush1.bf16.msra.mxu1 %v1063_v26 }
  0x2f   : > { %654 = vmatprep.subr.bf16.mxu1 %v1148_v2 }
  0x32   : > { %655 = vmatpush2.bf16.msra.mxu1 %v1064_v27 }
  0x33   : > { %656 = vmatprep.subr.bf16.mxu1 %v1148_v2 }
  0x35   : > { %450 = vmatmul.mubr.bf16.gmra.mxu0 %v1055_v18 }
  0x36   : > { %657 = vmatpush2.bf16.msra.mxu1 %v1065_v28 }
  0x37   : > { %658 = vmatprep.subr.bf16.mxu1 %v1148_v2 }
  0x3a   : > { %659 = vmatpush2.bf16.msra.mxu1 %v1066_v29 }
  0x3b   : > { %660 = vmatprep.subr.bf16.mxu1 %v1148_v2 }
  0x3e   : > { %661 = vmatpush2.bf16.msra.mxu1 %v1067_v30 }
  0xed   : > { %v441_v38 = vpop.f32.mrf.mxu0 }
  0xee   : > { %v1306_v39 = vadd.f32 %v441_v38, %v308_v36 }
  0xef   : > { %v443_v40 = vpop.f32.mrf.mxu0 }
  0xf0   : > { %v460_v41 = vsub.f32 0.0, %v1306_v39  ;;  %v1309_v42 = vadd.f32 %v443_v40, %v312_v37 }
  0xf1   : > { %v445_v43 = vpop.f32.mrf.mxu0 }
  0xf2   : > { %v468_v44 = vmul.f32 1.442695, %v460_v41  ;;  %v461_v45 = vsub.f32 0.0, %v1309_v42  ;;  %v446_v46 = vadd.f32 %v445_v43, %v308_v36 }
  0xf3   : > { %v447_v47 = vpop.f32.mrf.mxu0 }
  0xf4   : > { %v470_v48 = vmul.f32 1.442695, %v461_v45  ;;  %v462_v49 = vsub.f32 0.0, %v446_v46  ;;  %v448_v50 = vadd.f32 %v447_v47, %v312_v37  ;;  %1076 = vpow2.f32 %v468_v44  ;;  %v1070_v44 = vld [vmem:[%s1361_s5 + $0x28] sm:$0xff]   ;;  %v1071_v45 = vld [vmem:[%s1361_s5 + $0x20] sm:$0xff]   ;;  %v1073_v47 = vld [vmem:[%s1361_s5 + $0x10] sm:$0xff]  }
  0xf5   : > { %v451_v51 = vpop.f32.mrf.mxu0 }
  0xf6   : > { %1078 = vpow2.f32 %v470_v48  ;;  %v472_v52 = vmul.f32 1.442695, %v462_v49  ;;  %v463_v53 = vsub.f32 0.0, %v448_v50  ;;  %v1312_v54 = vadd.f32 %v451_v51, %v308_v36  ;;  %v1074_v48 = vld [vmem:[%s1361_s5 + $0x8] sm:$0xff]   ;;  %v1075_v49 = vld [vmem:[%s1361_s5] sm:$0xff]  }
  0xf7   : > { %v453_v55 = vpop.f32.mrf.mxu0 }
  0xf8   : > { %1080 = vpow2.f32 %v472_v52  ;;  %v474_v56 = vmul.f32 1.442695, %v463_v53  ;;  %v464_v57 = vsub.f32 0.0, %v1312_v54  ;;  %v454_v58 = vadd.f32 %v453_v55, %v312_v37 }
  0xf9   : > { %v455_v59 = vpop.f32.mrf.mxu0 }
  0xfa   : > { %1082 = vpow2.f32 %v474_v56  ;;  %v476_v60 = vmul.f32 1.442695, %v464_v57  ;;  %v465_v61 = vsub.f32 0.0, %v454_v58  ;;  %v456_v62 = vadd.f32 %v455_v59, %v308_v36 }
  0xfb   : > { %v457_v63 = vpop.f32.mrf.mxu0 }
  0xfc   : > { %v478_v0 = vmul.f32 1.442695, %v465_v61  ;;  %v466_v1 = vsub.f32 0.0, %v456_v62  ;;  %v458_v2 = vadd.f32 %v457_v63, %v312_v37  ;;  %1084 = vpow2.f32 %v476_v60 }
  0xfe   : > { %1086 = vpow2.f32 %v478_v0  ;;  %v480_v3 = vmul.f32 1.442695, %v466_v1  ;;  %v467_v4 = vsub.f32 0.0, %v458_v2 }
 0x100   : > { %1088 = vpow2.f32 %v480_v3  ;;  %v482_v5 = vmul.f32 1.442695, %v467_v4 }
 0x101   : > { %v1077_v6 = vpop.eup %1076 }
 0x102   : > { %1090 = vpow2.f32 %v482_v5  ;;  %v484_v10 = vadd.f32 1.0, %v1077_v6 }
 0x103   : > { %v1079_v7 = vpop.eup %1078 }
 0x104   : > { %v485_v8 = vadd.f32 1.0, %v1079_v7 }
 0x105   : > { %v1081_v9 = vpop.eup %1080 }
 0x106   : > { %v486_v11 = vadd.f32 1.0, %v1081_v9  ;;  %1092 = vrcp.f32 %v485_v8 }
 0x107   : > { %v1083_v12 = vpop.eup %1082 }
 0x108   : > { %1094 = vrcp.f32 %v486_v11  ;;  %v487_v13 = vadd.f32 1.0, %v1083_v12 }
 0x109   : > { %1096 = vrcp.f32 %v484_v10  ;;  %v1085_v14 = vpop.eup %1084 }
 0x10a   : > { %1098 = vrcp.f32 %v487_v13  ;;  %v488_v18 = vadd.f32 1.0, %v1085_v14 }
 0x10b   : > { %v1087_v15 = vpop.eup %1086 }
 0x10c   : > { %v489_v16 = vadd.f32 1.0, %v1087_v15 }
 0x10d   : > { %v1089_v17 = vpop.eup %1088 }
 0x10e   : > { %v490_v19 = vadd.f32 1.0, %v1089_v17  ;;  %1100 = vrcp.f32 %v489_v16 }
 0x10f   : > { %v1091_v20 = vpop.eup %1090 }
 0x110   : > { %1102 = vrcp.f32 %v490_v19  ;;  %v491_v21 = vadd.f32 1.0, %v1091_v20 }
 0x111   : > { %1104 = vrcp.f32 %v488_v18 }
 0x112   : > { %1106 = vrcp.f32 %v491_v21 }
 0x113   : > { %v1093_v22 = vpop.eup %1092 }
 0x114   : > { %v509_v27 = vmul.f32 %v1093_v22, %v1309_v42  ;;  %v1069_v42 = vld [vmem:[%s1361_s5 + $0x30] sm:$0xff]  }
 0x115   : > { %v1095_v23 = vpop.eup %1094 }
 0x116   : > { %v1097_v24 = vpop.eup %1096  ;;  %v510_v26 = vmul.f32 %v1095_v23, %v446_v46  ;;  %v1072_v46 = vld [vmem:[%s1361_s5 + $0x18] sm:$0xff]  }
 0x117   : > { %v1099_v25 = vpop.eup %1098  ;;  %v508_v29 = vmul.f32 %v1097_v24, %v1306_v39  ;;  %v1068_v39 = vld [vmem:[%s1361_s5 + $0x38] sm:$0xff]  }
 0x118   : > { %v511_v28 = vmul.f32 %v1099_v25, %v448_v50  ;;  %1001 = vmatprep.subr.bf16.mxu0 %v1068_v39  ;;  %v957_v50 = vld [vmem:[%s1360_s4] ss:$0 sm:$0xff] }
 0x119   : > { %v516_v31 = vpack.c.bf16 %v510_v26, %v508_v29  ;;  %1002 = vmatpush3.bf16.msra.mxu0 %v1068_v39  ;;  %v972_v25 = vld [vmem:[%s1362_s6] ss:$0 sm:$0xff] }
 0x11a   : > { %v517_v30 = vpack.c.bf16 %v511_v28, %v509_v27  ;;  %1003 = vmatprep.subr.bf16.mxu0 %v1069_v42 }
 0x11b   : > { %v1101_v32 = vpop.eup %1100 }
 0x11c   : > { %970 = vmatprep.mubr.msk.bf16.mxu1 %vm623_vm0, %v517_v30  ;;  %v513_v37 = vmul.f32 %v1101_v32, %v454_v58 }
 0x11d   : > { %v1103_v33 = vpop.eup %1102  ;;  %663 = vmatmul.mubr.bf16.vlgmr.msra.gmra.mxu1 %v516_v31  ;;  %1004 = vmatpush3.bf16.msra.mxu0 %v1069_v42 }
 0x11e   : > { %v1105_v34 = vpop.eup %1104  ;;  %v514_v36 = vmul.f32 %v1103_v33, %v456_v62  ;;  %1005 = vmatprep.subr.bf16.mxu0 %v1070_v44 }
 0x11f   : > { %v1107_v35 = vpop.eup %1106  ;;  %v512_v40 = vmul.f32 %v1105_v34, %v1312_v54 }
 0x120   : > { %v515_v38 = vmul.f32 %v1107_v35, %v458_v2 }
 0x121   : > { %v518_v43 = vpack.c.bf16 %v514_v36, %v512_v40  ;;  %1006 = vmatpush3.bf16.msra.mxu0 %v1070_v44 }
 0x122   : > { %v519_v41 = vpack.c.bf16 %v515_v38, %v513_v37  ;;  %1007 = vmatprep.subr.bf16.mxu0 %v1071_v45 }
 0x124   : > { %971 = vmatprep.mubr.msk.bf16.mxu1 %vm623_vm0, %v519_v41 }
 0x125   : > { %671 = vmatmul.mubr.bf16.gmra.mxu1 %v518_v43  ;;  %1008 = vmatpush3.bf16.msra.mxu0 %v1071_v45 }
 0x126   : > { %1009 = vmatprep.subr.bf16.mxu0 %v1072_v46 }
 0x129   : > { %1010 = vmatpush3.bf16.msra.mxu0 %v1072_v46 }
 0x12a   : > { %1011 = vmatprep.subr.bf16.mxu0 %v1073_v47 }
 0x12d   : > { %1012 = vmatpush3.bf16.msra.mxu0 %v1073_v47 }
 0x12e   : > { %1013 = vmatprep.subr.bf16.mxu0 %v1074_v48 }
 0x131   : > { %1014 = vmatpush3.bf16.msra.mxu0 %v1074_v48 }
 0x132   : > { %1015 = vmatprep.subr.bf16.mxu0 %v1075_v49 }
 0x135   : > { %1016 = vmatpush3.bf16.msra.mxu0 %v1075_v49 }
 0x1dd   : > { %v664_v51 = vpop.f32.mrf.mxu1 }
 0x1de   : > { %v665_v52 = vadd.f32 %v957_v50, %v664_v51 }
 0x1df   : > { %v666_v53 = vpop.f32.mrf.mxu1 }
 0x1e0   : > { %v679_v54 = vsub.f32 0.0, %v665_v52 }
 0x1e1   : > { %v667_v55 = vpop.f32.mrf.mxu1 }
 0x1e2   : > { %v683_v56 = vmul.f32 1.442695, %v679_v54  ;;  %v668_v57 = vadd.f32 %v957_v50, %v667_v55 }
 0x1e3   : > { %v669_v58 = vpop.f32.mrf.mxu1 }
 0x1e4   : > { %1108 = vpow2.f32 %v683_v56  ;;  %v680_v59 = vsub.f32 0.0, %v668_v57 }
 0x1e5   : > { %v672_v60 = vpop.f32.mrf.mxu1 }
 0x1e6   : > { %v685_v61 = vmul.f32 1.442695, %v680_v59  ;;  %v673_v62 = vadd.f32 %v957_v50, %v672_v60 }
 0x1e7   : > { %v674_v63 = vpop.f32.mrf.mxu1 }
 0x1e8   : > { %1110 = vpow2.f32 %v685_v61  ;;  %v681_v0 = vsub.f32 0.0, %v673_v62 }
 0x1e9   : > { %v675_v1 = vpop.f32.mrf.mxu1 }
 0x1ea   : > { %v687_v2 = vmul.f32 1.442695, %v681_v0  ;;  %v676_v3 = vadd.f32 %v957_v50, %v675_v1 }
 0x1eb   : > { %v677_v4 = vpop.f32.mrf.mxu1 }
 0x1ec   : > { %1112 = vpow2.f32 %v687_v2  ;;  %v682_v5 = vsub.f32 0.0, %v676_v3 }
 0x1ee   : > { %v689_v6 = vmul.f32 1.442695, %v682_v5 }
 0x1f0   : > { %1114 = vpow2.f32 %v689_v6 }
 0x1f1   : > { %v1109_v7 = vpop.eup %1108 }
 0x1f2   : > { %v691_v8 = vadd.f32 1.0, %v1109_v7 }
 0x1f4   : > { %1116 = vrcp.f32 %v691_v8 }
 0x1f5   : > { %v1111_v9 = vpop.eup %1110 }
 0x1f6   : > { %v692_v10 = vadd.f32 1.0, %v1111_v9 }
 0x1f8   : > { %1118 = vrcp.f32 %v692_v10 }
 0x1f9   : > { %v1113_v11 = vpop.eup %1112 }
 0x1fa   : > { %v693_v12 = vadd.f32 1.0, %v1113_v11 }
 0x1fc   : > { %1120 = vrcp.f32 %v693_v12 }
 0x1fd   : > { %v1115_v13 = vpop.eup %1114 }
 0x1fe   : > { %v694_v14 = vadd.f32 1.0, %v1115_v13 }
 0x200   : > { %1122 = vrcp.f32 %v694_v14 }
 0x201   : > { %v1117_v15 = vpop.eup %1116 }
 0x202   : > { %v703_v17 = vmul.f32 %v1117_v15, %v665_v52 }
 0x205   : > { %v1119_v16 = vpop.eup %1118 }
 0x206   : > { %v704_v18 = vmul.f32 %v1119_v16, %v668_v57 }
 0x208   : > { %v707_v19 = vpack.c.bf16 %v704_v18, %v703_v17 }
 0x209   : > { %v1121_v20 = vpop.eup %1120 }
 0x20a   : > { %1017 = vmatprep.mubr.bf16.mxu0 %v707_v19  ;;  %v705_v22 = vmul.f32 %v1121_v20, %v673_v62 }
 0x20d   : > { %v1123_v21 = vpop.eup %1122 }
 0x20e   : > { %v706_v23 = vmul.f32 %v1123_v21, %v676_v3 }
 0x210   : > { %v708_v24 = vpack.c.bf16 %v706_v23, %v705_v22 }
 0x212   : > { %1018 = vmatmul.mubr.bf16.vlgmr.msra.gmra.mxu0 %v708_v24 }
 0x2d2   : > { %v1019_v26 = vpop.f32.mrf.mxu0 }
 0x2d3   : > { %v823_v27 = vadd.f32 %v1019_v26, %v972_v25 }
 0x2d4   : > { %v814_v28 = vpop.f32.mrf.mxu0 }
 0x2d5   : > { %v831_v29 = vsub.f32 0.0, %v823_v27  ;;  %v815_v30 = vadd.f32 %v972_v25, %v814_v28 }
 0x2d6   : > { %v1020_v31 = vpop.f32.mrf.mxu0 }
 0x2d7   : > { %v837_v32 = vmul.f32 1.442695, %v831_v29  ;;  %v829_v33 = vsub.f32 0.0, %v815_v30  ;;  %v826_v34 = vadd.f32 %v1020_v31, %v972_v25 }
 0x2d8   : > { %v817_v35 = vpop.f32.mrf.mxu0 }
 0x2d9   : > { %1124 = vpow2.f32 %v837_v32  ;;  %v833_v36 = vmul.f32 1.442695, %v829_v33  ;;  %v832_v37 = vsub.f32 0.0, %v826_v34  ;;  %v818_v38 = vadd.f32 %v972_v25, %v817_v35 }
 0x2db   : > { %1126 = vpow2.f32 %v833_v36  ;;  %v839_v40 = vmul.f32 1.442695, %v832_v37  ;;  %v830_v41 = vsub.f32 0.0, %v818_v38 }
 0x2dd   : > { %1128 = vpow2.f32 %v839_v40  ;;  %v835_v43 = vmul.f32 1.442695, %v830_v41 }
 0x2df   : > { %1130 = vpow2.f32 %v835_v43 }
 0x2e6   : > { %v1125_v39 = vpop.eup %1124 }
 0x2e7   : > { %v843_v44 = vadd.f32 1.0, %v1125_v39 }
 0x2e8   : > { %v1127_v42 = vpop.eup %1126 }
 0x2e9   : > { %v841_v45 = vadd.f32 1.0, %v1127_v42 }
 0x2ea   : > { %v1129_v46 = vpop.eup %1128 }
 0x2eb   : > { %1132 = vrcp.f32 %v841_v45  ;;  %v844_v47 = vadd.f32 1.0, %v1129_v46 }
 0x2ec   : > { %v1131_v48 = vpop.eup %1130  ;;  %1134 = vrcp.f32 %v843_v44 }
 0x2ed   : > { %v842_v49 = vadd.f32 1.0, %v1131_v48  ;;  %1136 = vrcp.f32 %v844_v47 }
 0x2ef   : > { %1138 = vrcp.f32 %v842_v49 }
 0x2f8   : > { %v1133_v50 = vpop.eup %1132 }
 0x2f9   : > { %v987_v51 = vpack.c.bf16 %v1133_v50, %v1133_v50  ;;  %v1135_v52 = vpop.eup %1134 }
 0x2fa   : > { %v1137_v53 = vpop.eup %1136  ;;  %v989_v56 = vpack.c.bf16 %v1135_v52, %v1135_v52 }
 0x2fb   : > { %870 = vst.msk [vmem:[%s280_s30] sm:$0xf] %vm869_vm1, %v987_v51  ;;  %v990_v57 = vpack.c.bf16 %v1137_v53, %v1137_v53 }
 0x2fc   : > { %v1139_v54 = vpop.eup %1138  ;;  %872 = vst.msk [vmem:[%s280_s30 + $0x8] sm:$0xf] %vm869_vm1, %v989_v56 }
 0x2fd   : > { %v988_v55 = vpack.c.bf16 %v1139_v54, %v1139_v54  ;;  %873 = vst.msk [vmem:[%s280_s30 + $0xc] sm:$0xf] %vm869_vm1, %v990_v57 }
 0x2ff   : > { %871 = vst.msk [vmem:[%s280_s30 + $0x4] sm:$0xf] %vm869_vm1, %v988_v55 }
 0x300 PF: > { %s17_s24 = sadd.s32 1, %s1146_s24  }
 0x301   : > { %p14_p4 = scmp.ge.s32.totalorder %s17_s24, 4  }
 0x303   :  { %16 = sbr.rel (!%p14_p4) target bundleno = 1 (0x1), region = 78 }

</bundles_post_ra>
